<compile_context>
chip_gen: v6e
topology: v6e:2x2x1
jax: 0.10.0
libtpu: 0.0.40
codegen_flags: <defaults>
</compile_context>

<pallas_src>
import functools

import jax
import jax.numpy as jnp
from jax.experimental import pallas as pl
from jax.experimental.pallas import tpu as pltpu

BN_EPS = 1e-5


def _round_up(n, m):
    return ((n + m - 1) // m) * m


def _pad2(a, rows, cols):
    return jnp.pad(a, ((0, rows - a.shape[0]), (0, cols - a.shape[1])))


# ---------------------------------------------------------------------------
# Kernel.  grid = (num_hidden + 1, num_row_tiles)
#   axis 0 (l): layer phase ("arbitrary") -- stats of layer l-1 are finalized
#               at (l, t=0) before any tile of layer l is normalized.
#   axis 1 (t): row tiles ("arbitrary") -- carries the running sum / sum-sq.
# ---------------------------------------------------------------------------
def _fused_mlp_kernel(x_ref, w0_ref, *rest,
                      num_hidden, n_rows, row_tile, compute_dtype):
    if num_hidden > 1:
        (w_mid_ref, gb_ref, wf_ref, bf_ref, o_ref,
         h_scr, stats_ref, ss_ref) = rest
    else:
        (gb_ref, wf_ref, bf_ref, o_ref,
         h_scr, stats_ref, ss_ref) = rest
        w_mid_ref = None

    l = pl.program_id(0)
    t = pl.program_id(1)
    last = num_hidden                    # grid index of the final linear
    inv_n = 1.0 / n_rows                 # true row count (pad rows excluded)

    # --- finalize BN of layer l-1: scale = gamma*rsqrt(var+eps),
    #     shift = beta - mean*scale.  Runs once per layer phase. -------------
    @pl.when((t == 0) & (l > 0))
    def _():
        prev = jnp.maximum(l - 1, 0)
        mean = stats_ref[0:1, :] * inv_n
        var = stats_ref[1:2, :] * inv_n - mean * mean
        gb = gb_ref[prev]                                    # (2, hid_pad)
        scale = gb[0:1, :] * jax.lax.rsqrt(var + BN_EPS)
        ss_ref[0:1, :] = scale
        ss_ref[1:2, :] = gb[1:2, :] - mean * scale

    # --- reset running sums for the layer about to be computed --------------
    @pl.when(t == 0)
    def _():
        stats_ref[...] = jnp.zeros_like(stats_ref)

    # rows of this tile that are real (edge tile may run past n_rows)
    row_ids = jax.lax.broadcasted_iota(jnp.int32, (row_tile, 1), 0) + t * row_tile
    row_mask = row_ids < n_rows

    def store_and_accumulate(z):
        z = jnp.where(row_mask, z, 0.0)          # pad rows must stay zero
        h_scr[t] = z
        stats_ref[0:1, :] += jnp.sum(z, axis=0, keepdims=True)
        stats_ref[1:2, :] += jnp.sum(z * z, axis=0, keepdims=True)

    def normalized_prev():
        # relu(z*scale + shift); hidden Linear bias omitted (cancels under
        # the BN mean subtraction).
        return jnp.maximum(h_scr[t] * ss_ref[0:1, :] + ss_ref[1:2, :], 0.0)

    # --- layer 0: z0 = x @ W0 ------------------------------------------------
    @pl.when(l == 0)
    def _():
        z = jnp.dot(x_ref[...].astype(compute_dtype), w0_ref[...],
                    preferred_element_type=jnp.float32)
        store_and_accumulate(z)

    # --- hidden layers 1 .. num_hidden-1 -------------------------------------
    if num_hidden > 1:
        @pl.when((l > 0) & (l < last))
        def _():
            w = w_mid_ref[jnp.maximum(l - 1, 0)]
            z = jnp.dot(normalized_prev().astype(compute_dtype), w,
                        preferred_element_type=jnp.float32)
            store_and_accumulate(z)

    # --- final linear (bias, no BN / relu) ------------------------------------
    @pl.when(l == last)
    def _():
        h = normalized_prev().astype(compute_dtype)
        o_ref[...] = (jnp.dot(h, wf_ref[...],
                              preferred_element_type=jnp.float32)
                      + bf_ref[...])


# ---------------------------------------------------------------------------
# One-time parameter packing (outside the per-call hot path): pad feature
# lanes, pre-cast matmul weights to compute_dtype, stack gamma/beta.
# ---------------------------------------------------------------------------
def pack_mlp_params(params, *, compute_dtype=jnp.float32, lane=None):
    hidden = params["hidden"]
    w_last, b_last = params["final"]
    num_hidden = len(hidden)
    input_dim, hidden_dim = hidden[0][0].shape
    output_dim = w_last.shape[1]
    if lane is None:
        lane = 256 if hidden_dim > 128 else 128   # fill the 256-wide MXU
    hid_pad = _round_up(hidden_dim, lane)

    packed = {"w0": _pad2(hidden[0][0], input_dim, hid_pad).astype(compute_dtype)}
    if num_hidden > 1:
        packed["w_mid"] = jnp.stack(
            [_pad2(w, hid_pad, hid_pad) for (w, _b, _g, _bt) in hidden[1:]]
        ).astype(compute_dtype)
    packed["gb"] = jnp.stack(
        [jnp.concatenate([_pad2(g, 1, hid_pad), _pad2(bt, 1, hid_pad)], axis=0)
         for (_w, _b, g, bt) in hidden]).astype(jnp.float32)
    packed["wf"] = _pad2(w_last, hid_pad, output_dim).astype(compute_dtype)
    packed["bf"] = b_last.astype(jnp.float32)
    return packed


# ---------------------------------------------------------------------------
# Forward wrapper: one pallas_call over a (layers+1, row_tiles) grid.
# ---------------------------------------------------------------------------
@functools.partial(jax.jit, static_argnames=("row_tile",))
def mlp_forward(x, packed, *, row_tile=None):
    n, input_dim = x.shape
    w0, gb, wf, bf = packed["w0"], packed["gb"], packed["wf"], packed["bf"]
    num_hidden = gb.shape[0]
    hid_pad = w0.shape[1]
    output_dim = wf.shape[1]
    compute_dtype = w0.dtype

    if row_tile is None:
        row_tile = n if n <= 512 else 512
    if row_tile < n:
        row_tile = _round_up(row_tile, 8)          # sublane alignment
    row_tile = min(row_tile, n)
    num_tiles = -(-n // row_tile)
    last_idx = num_hidden

    x = x.astype(jnp.float32)

    # x is only consumed in layer phase 0; pin its block index afterwards so
    # it is not re-DMA'd every phase.  Same trick keeps the output block
    # resident (no stale intermediate writebacks) until the final phase.
    args = [x, w0]
    in_specs = [
        pl.BlockSpec((row_tile, input_dim),
                     lambda l, t: (jnp.where(l == 0, t, 0), 0)),
        pl.BlockSpec(w0.shape, lambda l, t: (0, 0)),          # resident
    ]
    if num_hidden > 1:
        args.append(packed["w_mid"])
        in_specs.append(pl.BlockSpec(packed["w_mid"].shape,
                                     lambda l, t: (0, 0, 0)))  # resident
    args += [gb, wf, bf]
    in_specs += [
        pl.BlockSpec(gb.shape, lambda l, t: (0, 0, 0)),        # resident
        pl.BlockSpec(wf.shape, lambda l, t: (0, 0)),           # resident
        pl.BlockSpec(bf.shape, lambda l, t: (0, 0)),           # resident
    ]
    out_spec = pl.BlockSpec((row_tile, output_dim),
                            lambda l, t: (jnp.where(l == last_idx, t, 0), 0))

    scratch = [
        pltpu.VMEM((num_tiles, row_tile, hid_pad), jnp.float32),  # resident z
        pltpu.VMEM((2, hid_pad), jnp.float32),                    # sum / sumsq
        pltpu.VMEM((2, hid_pad), jnp.float32),                    # scale/shift
    ]

    # VMEM budget (scratch + resident weights + double-buffered x/out tiles).
    w_item = jnp.dtype(compute_dtype).itemsize
    weight_bytes = (w0.size + wf.size
                    + (packed["w_mid"].size if num_hidden > 1 else 0)) * w_item \
                   + (gb.size + bf.size) * 4
    scratch_bytes = (num_tiles * row_tile * hid_pad + 4 * hid_pad) * 4
    stream_bytes = 2 * row_tile * (input_dim + output_dim) * 4
    vmem_limit = int(min(max(weight_bytes + scratch_bytes + stream_bytes
                             + (4 << 20), 16 << 20), 56 << 20))

    flops = 2 * n * (input_dim * hid_pad
                     + (num_hidden - 1) * hid_pad * hid_pad
                     + hid_pad * output_dim)
    cost = pl.CostEstimate(
        flops=int(flops),
        transcendentals=int(num_hidden * hid_pad),
        bytes_accessed=int(x.size * 4 + weight_bytes + n * output_dim * 4))

    kernel = functools.partial(
        _fused_mlp_kernel, num_hidden=num_hidden, n_rows=n,
        row_tile=row_tile, compute_dtype=compute_dtype)

    return pl.pallas_call(
        kernel,
        grid=(num_hidden + 1, num_tiles),
        in_specs=in_specs,
        out_specs=out_spec,
        out_shape=jax.ShapeDtypeStruct((n, output_dim), jnp.float32),
        scratch_shapes=scratch,
        compiler_params=pltpu.CompilerParams(
            dimension_semantics=("arbitrary", "arbitrary"),
            vmem_limit_bytes=vmem_limit),
        cost_estimate=cost,
    )(*args)


# ---------------------------------------------------------------------------
# Parameter init (mirrors nn.Linear U(-1/sqrt(fan_in), ..), BN gamma=1 beta=0)
# ---------------------------------------------------------------------------
def init_mlp_params(key, num_layers, input_dim, hidden_dim, output_dim):
    assert num_layers >= 2, "this script implements the multi-layer branch"
    dims = [input_dim] + [hidden_dim] * (num_layers - 1) + [output_dim]
    hidden_params = []
    for i in range(num_layers - 1):
        key, kw, kb = jax.random.split(key, 3)
        bound = 1.0 / (dims[i] ** 0.5)
        w = jax.random.uniform(kw, (dims[i], dims[i + 1]), jnp.float32,
                               -bound, bound)
        b = jax.random.uniform(kb, (1, dims[i + 1]), jnp.float32, -bound, bound)
        gamma = jnp.ones((1, dims[i + 1]), jnp.float32)
        beta = jnp.zeros((1, dims[i + 1]), jnp.float32)
        hidden_params.append((w, b, gamma, beta))
    key, kw, kb = jax.random.split(key, 3)
    bound = 1.0 / (dims[-2] ** 0.5)
    w_last = jax.random.uniform(kw, (dims[-2], dims[-1]), jnp.float32,
                                -bound, bound)
    b_last = jax.random.uniform(kb, (1, dims[-1]), jnp.float32, -bound, bound)
    return {"hidden": hidden_params, "final": (w_last, b_last)}


# ---------------------------------------------------------------------------
# Pure-JAX reference (full PyTorch semantics incl. bias / gamma / beta, so the
# bias-cancellation + folding in the kernel is verified numerically).
# ---------------------------------------------------------------------------
def mlp_reference(x, params, compute_dtype=jnp.float32):
    h = x
    for (w, b, gamma, beta) in params["hidden"]:
        z = jnp.dot(h.astype(compute_dtype), w.astype(compute_dtype),
                    preferred_element_type=jnp.float32) + b
        mean = jnp.mean(z, axis=0, keepdims=True)
        var = jnp.mean((z - mean) ** 2, axis=0, keepdims=True)
        z = (z - mean) / jnp.sqrt(var + BN_EPS) * gamma + beta
        h = jnp.maximum(z, 0.0)
    w_last, b_last = params["final"]
    return jnp.dot(h.astype(compute_dtype), w_last.astype(compute_dtype),
                   preferred_element_type=jnp.float32) + b_last


if __name__ == "__main__":
    num_layers = 3
    input_dim = 16
    hidden_dim = 32
    output_dim = 8
    batch = 20   # node count; not a multiple of the row tile -> exercises masking

    key = jax.random.PRNGKey(0)
    key, kx = jax.random.split(key)
    x = jax.random.normal(kx, (batch, input_dim), jnp.float32)
    params = init_mlp_params(key, num_layers, input_dim, hidden_dim, output_dim)
    ref = mlp_reference(x, params)

    # f32 path, row-tiled (3 tiles, edge tile masked).
    packed_f32 = pack_mlp_params(params, compute_dtype=jnp.float32)
    out = jax.block_until_ready(mlp_forward(x, packed_f32, row_tile=8))
    assert out.shape == (batch, output_dim), out.shape
    assert jnp.allclose(out, ref, atol=2e-4, rtol=2e-4), "f32 tiled mismatch"

    # f32 path, single tile (default tiling).
    out_full = jax.block_until_ready(mlp_forward(x, packed_f32))
    assert jnp.allclose(out_full, ref, atol=2e-4, rtol=2e-4), "f32 full mismatch"

    # bf16 MXU operands (valid on v5e/v6e/v7x); BN / ReLU stay f32.
    packed_bf16 = pack_mlp_params(params, compute_dtype=jnp.bfloat16)
    out_bf16 = jax.block_until_ready(mlp_forward(x, packed_bf16, row_tile=8))
    ref_bf16 = mlp_reference(x, params, compute_dtype=jnp.bfloat16)
    assert jnp.allclose(out_bf16, ref_bf16, atol=2e-2, rtol=2e-2), "bf16 mismatch"

    print("KERNEL_OK")
</pallas_src>

<mosaic_0001>
module attributes {stable_mosaic.version = 11 : i64} {
  func.func @_fused_mlp_kernel(%arg0: i32, %arg1: i32, %arg2: memref<8x16xf32, #tpu.memory_space<vmem>>, %arg3: memref<16x128xf32, #tpu.memory_space<vmem>>, %arg4: memref<1x128x128xf32, #tpu.memory_space<vmem>>, %arg5: memref<2x2x128xf32, #tpu.memory_space<vmem>>, %arg6: memref<128x8xf32, #tpu.memory_space<vmem>>, %arg7: memref<1x8xf32, #tpu.memory_space<vmem>>, %arg8: memref<8x8xf32, #tpu.memory_space<vmem>>, %arg9: memref<3x8x128xf32, #tpu.memory_space<vmem>>, %arg10: memref<2x128xf32, #tpu.memory_space<vmem>>, %arg11: memref<2x128xf32, #tpu.memory_space<vmem>>) attributes {dimension_semantics = [#tpu.dimension_semantics<arbitrary>, #tpu.dimension_semantics<arbitrary>], iteration_bounds = array<i64: 3, 3>, scalar_prefetch = 0 : i64, scratch_operands = 3 : i64, tpu.core_type = #tpu.core_type<tc>, window_params = [{transform_indices = @transform_0, window_bounds = array<i64: 8, 16>}, {pipeline_mode = #tpu.pipeline_mode<synchronous>, transform_indices = @transform_1, window_bounds = array<i64: 16, 128>}, {pipeline_mode = #tpu.pipeline_mode<synchronous>, transform_indices = @transform_2, window_bounds = array<i64: 1, 128, 128>}, {pipeline_mode = #tpu.pipeline_mode<synchronous>, transform_indices = @transform_3, window_bounds = array<i64: 2, 2, 128>}, {pipeline_mode = #tpu.pipeline_mode<synchronous>, transform_indices = @transform_4, window_bounds = array<i64: 128, 8>}, {pipeline_mode = #tpu.pipeline_mode<synchronous>, transform_indices = @transform_5, window_bounds = array<i64: 1, 8>}, {transform_indices = @transform_6, window_bounds = array<i64: 8, 8>}]} {
    %c0_i32 = arith.constant 0 : i32
    %0 = arith.cmpi eq, %arg1, %c0_i32 : i32
    %c0_i32_0 = arith.constant 0 : i32
    %1 = arith.cmpi sgt, %arg0, %c0_i32_0 : i32
    %2 = arith.andi %0, %1 : i1
    %3 = arith.extui %2 : i1 to i32
    %c0_i32_1 = arith.constant 0 : i32
    %4 = arith.cmpi ne, %3, %c0_i32_1 : i32
    scf.if %4 {
      %c1_i32 = arith.constant 1 : i32
      %25 = arith.subi %arg0, %c1_i32 : i32
      %c0_i32_10 = arith.constant 0 : i32
      %26 = arith.maxsi %25, %c0_i32_10 : i32
      %c0 = arith.constant 0 : index
      %c0_11 = arith.constant 0 : index
      %27 = vector.load %arg10[%c0, %c0_11] : memref<2x128xf32, #tpu.memory_space<vmem>>, vector<1x128xf32>
      %cst = arith.constant 5.000000e-02 : f32
      %28 = vector.broadcast %cst : f32 to vector<1x128xf32>
      %29 = arith.mulf %27, %28 : vector<1x128xf32>
      %c1 = arith.constant 1 : index
      %c0_12 = arith.constant 0 : index
      %30 = vector.load %arg10[%c1, %c0_12] : memref<2x128xf32, #tpu.memory_space<vmem>>, vector<1x128xf32>
      %cst_13 = arith.constant 5.000000e-02 : f32
      %31 = vector.broadcast %cst_13 : f32 to vector<1x128xf32>
      %32 = arith.mulf %30, %31 : vector<1x128xf32>
      %33 = arith.mulf %29, %29 : vector<1x128xf32>
      %34 = arith.subf %32, %33 : vector<1x128xf32>
      %35 = arith.index_cast %26 : i32 to index
      %c0_14 = arith.constant 0 : index
      %c0_15 = arith.constant 0 : index
      %36 = vector.load %arg5[%35, %c0_14, %c0_15] : memref<2x2x128xf32, #tpu.memory_space<vmem>>, vector<1x2x128xf32>
      %37 = vector.shape_cast %36 : vector<1x2x128xf32> to vector<2x128xf32>
      %38 = vector.extract_strided_slice %37 {offsets = [0, 0], sizes = [1, 128], strides = [1, 1]} : vector<2x128xf32> to vector<1x128xf32>
      %cst_16 = arith.constant 9.99999974E-6 : f32
      %39 = vector.broadcast %cst_16 : f32 to vector<1x128xf32>
      %40 = arith.addf %34, %39 : vector<1x128xf32>
      %41 = math.rsqrt %40 : vector<1x128xf32>
      %42 = arith.mulf %38, %41 : vector<1x128xf32>
      %c0_17 = arith.constant 0 : index
      %c0_18 = arith.constant 0 : index
      %43 = vector.load %arg11[%c0_17, %c0_18] : memref<2x128xf32, #tpu.memory_space<vmem>>, vector<1x128xf32>
      tpu.vector_store %arg11[%c0_17, %c0_18], %42 {strides = array<i32>} : memref<2x128xf32, #tpu.memory_space<vmem>>, vector<1x128xf32>,
      %44 = vector.extract_strided_slice %37 {offsets = [1, 0], sizes = [1, 128], strides = [1, 1]} : vector<2x128xf32> to vector<1x128xf32>
      %45 = arith.mulf %29, %42 : vector<1x128xf32>
      %46 = arith.subf %44, %45 : vector<1x128xf32>
      %c1_19 = arith.constant 1 : index
      %c0_20 = arith.constant 0 : index
      %47 = vector.load %arg11[%c1_19, %c0_20] : memref<2x128xf32, #tpu.memory_space<vmem>>, vector<1x128xf32>
      tpu.vector_store %arg11[%c1_19, %c0_20], %46 {strides = array<i32>} : memref<2x128xf32, #tpu.memory_space<vmem>>, vector<1x128xf32>,
    } else {
    }
    %c0_i32_2 = arith.constant 0 : i32
    %5 = arith.cmpi eq, %arg1, %c0_i32_2 : i32
    %6 = arith.extui %5 : i1 to i32
    %c0_i32_3 = arith.constant 0 : i32
    %7 = arith.cmpi ne, %6, %c0_i32_3 : i32
    scf.if %7 {
      %cst = arith.constant 0.000000e+00 : f32
      %25 = vector.broadcast %cst : f32 to vector<2x128xf32>
      %c0 = arith.constant 0 : index
      %c0_10 = arith.constant 0 : index
      %26 = vector.load %arg10[%c0, %c0_10] : memref<2x128xf32, #tpu.memory_space<vmem>>, vector<2x128xf32>
      tpu.vector_store %arg10[%c0, %c0_10], %25 {strides = array<i32>} : memref<2x128xf32, #tpu.memory_space<vmem>>, vector<2x128xf32>,
    } else {
    }
    %8 = tpu.iota {dimensions = array<i32: 0>} : vector<8x1xi32>
    %c8_i32 = arith.constant 8 : i32
    %9 = arith.muli %arg1, %c8_i32 : i32
    %10 = vector.broadcast %9 : i32 to vector<8x1xi32>
    %11 = arith.addi %8, %10 : vector<8x1xi32>
    %c20_i32 = arith.constant 20 : i32
    %12 = vector.broadcast %c20_i32 : i32 to vector<8x1xi32>
    %13 = arith.cmpi slt, %11, %12 : vector<8x1xi32>
    %c0_i32_4 = arith.constant 0 : i32
    %14 = arith.cmpi eq, %arg0, %c0_i32_4 : i32
    %15 = arith.extui %14 : i1 to i32
    %c0_i32_5 = arith.constant 0 : i32
    %16 = arith.cmpi ne, %15, %c0_i32_5 : i32
    scf.if %16 {
      %c0 = arith.constant 0 : index
      %c0_10 = arith.constant 0 : index
      %25 = vector.load %arg2[%c0, %c0_10] : memref<8x16xf32, #tpu.memory_space<vmem>>, vector<8x16xf32>
      %c0_11 = arith.constant 0 : index
      %c0_12 = arith.constant 0 : index
      %26 = vector.load %arg3[%c0_11, %c0_12] : memref<16x128xf32, #tpu.memory_space<vmem>>, vector<16x128xf32>
      %cst = arith.constant dense<0.000000e+00> : vector<8x128xf32>
      %27 = tpu.matmul %25, %26, %cst {dimension_numbers = #tpu.dot_dimension_numbers<[1], [0], [0], [1], [0, 0, 1, 1], [], []>} : vector<8x16xf32>, vector<16x128xf32>, vector<8x128xf32> -> vector<8x128xf32>
      %cst_13 = arith.constant 0.000000e+00 : f32
      %28 = vector.shape_cast %13 : vector<8x1xi1> to vector<8x1xi1>
      %29 = vector.broadcast %28 : vector<8x1xi1> to vector<8x128xi1>
      %30 = vector.broadcast %cst_13 : f32 to vector<8x128xf32>
      %31 = arith.select %29, %27, %30 : vector<8x128xi1>, vector<8x128xf32>
      %32 = arith.index_cast %arg1 : i32 to index
      %c0_14 = arith.constant 0 : index
      %c0_15 = arith.constant 0 : index
      %33 = vector.load %arg9[%32, %c0_14, %c0_15] : memref<3x8x128xf32, #tpu.memory_space<vmem>>, vector<1x8x128xf32>
      %34 = vector.shape_cast %33 : vector<1x8x128xf32> to vector<8x128xf32>
      %35 = vector.shape_cast %31 : vector<8x128xf32> to vector<1x8x128xf32>
      tpu.vector_store %arg9[%32, %c0_14, %c0_15], %35 {strides = array<i32>} : memref<3x8x128xf32, #tpu.memory_space<vmem>>, vector<1x8x128xf32>,
      %c0_16 = arith.constant 0 : index
      %c0_17 = arith.constant 0 : index
      %36 = vector.load %arg10[%c0_16, %c0_17] : memref<2x128xf32, #tpu.memory_space<vmem>>, vector<1x128xf32>
      %cst_18 = arith.constant dense<0.000000e+00> : vector<128xf32>
      %37 = vector.multi_reduction <add>, %31, %cst_18 [0] : vector<8x128xf32> to vector<128xf32>
      %38 = vector.shape_cast %37 : vector<128xf32> to vector<1x128xf32>
      %39 = arith.addf %36, %38 : vector<1x128xf32>
      %c0_19 = arith.constant 0 : index
      %c0_20 = arith.constant 0 : index
      %40 = vector.load %arg10[%c0_19, %c0_20] : memref<2x128xf32, #tpu.memory_space<vmem>>, vector<1x128xf32>
      tpu.vector_store %arg10[%c0_19, %c0_20], %39 {strides = array<i32>} : memref<2x128xf32, #tpu.memory_space<vmem>>, vector<1x128xf32>,
      %c1 = arith.constant 1 : index
      %c0_21 = arith.constant 0 : index
      %41 = vector.load %arg10[%c1, %c0_21] : memref<2x128xf32, #tpu.memory_space<vmem>>, vector<1x128xf32>
      %42 = arith.mulf %31, %31 : vector<8x128xf32>
      %cst_22 = arith.constant dense<0.000000e+00> : vector<128xf32>
      %43 = vector.multi_reduction <add>, %42, %cst_22 [0] : vector<8x128xf32> to vector<128xf32>
      %44 = vector.shape_cast %43 : vector<128xf32> to vector<1x128xf32>
      %45 = arith.addf %41, %44 : vector<1x128xf32>
      %c1_23 = arith.constant 1 : index
      %c0_24 = arith.constant 0 : index
      %46 = vector.load %arg10[%c1_23, %c0_24] : memref<2x128xf32, #tpu.memory_space<vmem>>, vector<1x128xf32>
      tpu.vector_store %arg10[%c1_23, %c0_24], %45 {strides = array<i32>} : memref<2x128xf32, #tpu.memory_space<vmem>>, vector<1x128xf32>,
    } else {
    }
    %c0_i32_6 = arith.constant 0 : i32
    %17 = arith.cmpi sgt, %arg0, %c0_i32_6 : i32
    %c2_i32 = arith.constant 2 : i32
    %18 = arith.cmpi slt, %arg0, %c2_i32 : i32
    %19 = arith.andi %17, %18 : i1
    %20 = arith.extui %19 : i1 to i32
    %c0_i32_7 = arith.constant 0 : i32
    %21 = arith.cmpi ne, %20, %c0_i32_7 : i32
    scf.if %21 {
      %c1_i32 = arith.constant 1 : i32
      %25 = arith.subi %arg0, %c1_i32 : i32
      %c0_i32_10 = arith.constant 0 : i32
      %26 = arith.maxsi %25, %c0_i32_10 : i32
      %27 = arith.index_cast %26 : i32 to index
      %c0 = arith.constant 0 : index
      %c0_11 = arith.constant 0 : index
      %28 = vector.load %arg4[%27, %c0, %c0_11] : memref<1x128x128xf32, #tpu.memory_space<vmem>>, vector<1x128x128xf32>
      %29 = vector.shape_cast %28 : vector<1x128x128xf32> to vector<128x128xf32>
      %30 = arith.index_cast %arg1 : i32 to index
      %c0_12 = arith.constant 0 : index
      %c0_13 = arith.constant 0 : index
      %31 = vector.load %arg9[%30, %c0_12, %c0_13] : memref<3x8x128xf32, #tpu.memory_space<vmem>>, vector<1x8x128xf32>
      %32 = vector.shape_cast %31 : vector<1x8x128xf32> to vector<8x128xf32>
      %c0_14 = arith.constant 0 : index
      %c0_15 = arith.constant 0 : index
      %33 = vector.load %arg11[%c0_14, %c0_15] : memref<2x128xf32, #tpu.memory_space<vmem>>, vector<1x128xf32>
      %34 = vector.broadcast %33 : vector<1x128xf32> to vector<8x128xf32>
      %35 = arith.mulf %32, %34 : vector<8x128xf32>
      %c1 = arith.constant 1 : index
      %c0_16 = arith.constant 0 : index
      %36 = vector.load %arg11[%c1, %c0_16] : memref<2x128xf32, #tpu.memory_space<vmem>>, vector<1x128xf32>
      %37 = vector.broadcast %36 : vector<1x128xf32> to vector<8x128xf32>
      %38 = arith.addf %35, %37 : vector<8x128xf32>
      %cst = arith.constant 0.000000e+00 : f32
      %39 = vector.broadcast %cst : f32 to vector<8x128xf32>
      %40 = arith.maximumf %38, %39 : vector<8x128xf32>
      %cst_17 = arith.constant dense<0.000000e+00> : vector<8x128xf32>
      %41 = tpu.matmul %40, %29, %cst_17 {dimension_numbers = #tpu.dot_dimension_numbers<[1], [0], [0], [1], [0, 0, 1, 1], [], []>} : vector<8x128xf32>, vector<128x128xf32>, vector<8x128xf32> -> vector<8x128xf32>
      %cst_18 = arith.constant 0.000000e+00 : f32
      %42 = vector.shape_cast %13 : vector<8x1xi1> to vector<8x1xi1>
      %43 = vector.broadcast %42 : vector<8x1xi1> to vector<8x128xi1>
      %44 = vector.broadcast %cst_18 : f32 to vector<8x128xf32>
      %45 = arith.select %43, %41, %44 : vector<8x128xi1>, vector<8x128xf32>
      %46 = arith.index_cast %arg1 : i32 to index
      %c0_19 = arith.constant 0 : index
      %c0_20 = arith.constant 0 : index
      %47 = vector.load %arg9[%46, %c0_19, %c0_20] : memref<3x8x128xf32, #tpu.memory_space<vmem>>, vector<1x8x128xf32>
      %48 = vector.shape_cast %47 : vector<1x8x128xf32> to vector<8x128xf32>
      %49 = vector.shape_cast %45 : vector<8x128xf32> to vector<1x8x128xf32>
      tpu.vector_store %arg9[%46, %c0_19, %c0_20], %49 {strides = array<i32>} : memref<3x8x128xf32, #tpu.memory_space<vmem>>, vector<1x8x128xf32>,
      %c0_21 = arith.constant 0 : index
      %c0_22 = arith.constant 0 : index
      %50 = vector.load %arg10[%c0_21, %c0_22] : memref<2x128xf32, #tpu.memory_space<vmem>>, vector<1x128xf32>
      %cst_23 = arith.constant dense<0.000000e+00> : vector<128xf32>
      %51 = vector.multi_reduction <add>, %45, %cst_23 [0] : vector<8x128xf32> to vector<128xf32>
      %52 = vector.shape_cast %51 : vector<128xf32> to vector<1x128xf32>
      %53 = arith.addf %50, %52 : vector<1x128xf32>
      %c0_24 = arith.constant 0 : index
      %c0_25 = arith.constant 0 : index
      %54 = vector.load %arg10[%c0_24, %c0_25] : memref<2x128xf32, #tpu.memory_space<vmem>>, vector<1x128xf32>
      tpu.vector_store %arg10[%c0_24, %c0_25], %53 {strides = array<i32>} : memref<2x128xf32, #tpu.memory_space<vmem>>, vector<1x128xf32>,
      %c1_26 = arith.constant 1 : index
      %c0_27 = arith.constant 0 : index
      %55 = vector.load %arg10[%c1_26, %c0_27] : memref<2x128xf32, #tpu.memory_space<vmem>>, vector<1x128xf32>
      %56 = arith.mulf %45, %45 : vector<8x128xf32>
      %cst_28 = arith.constant dense<0.000000e+00> : vector<128xf32>
      %57 = vector.multi_reduction <add>, %56, %cst_28 [0] : vector<8x128xf32> to vector<128xf32>
      %58 = vector.shape_cast %57 : vector<128xf32> to vector<1x128xf32>
      %59 = arith.addf %55, %58 : vector<1x128xf32>
      %c1_29 = arith.constant 1 : index
      %c0_30 = arith.constant 0 : index
      %60 = vector.load %arg10[%c1_29, %c0_30] : memref<2x128xf32, #tpu.memory_space<vmem>>, vector<1x128xf32>
      tpu.vector_store %arg10[%c1_29, %c0_30], %59 {strides = array<i32>} : memref<2x128xf32, #tpu.memory_space<vmem>>, vector<1x128xf32>,
    } else {
    }
    %c2_i32_8 = arith.constant 2 : i32
    %22 = arith.cmpi eq, %arg0, %c2_i32_8 : i32
    %23 = arith.extui %22 : i1 to i32
    %c0_i32_9 = arith.constant 0 : i32
    %24 = arith.cmpi ne, %23, %c0_i32_9 : i32
    scf.if %24 {
      %25 = arith.index_cast %arg1 : i32 to index
      %c0 = arith.constant 0 : index
      %c0_10 = arith.constant 0 : index
      %26 = vector.load %arg9[%25, %c0, %c0_10] : memref<3x8x128xf32, #tpu.memory_space<vmem>>, vector<1x8x128xf32>
      %27 = vector.shape_cast %26 : vector<1x8x128xf32> to vector<8x128xf32>
      %c0_11 = arith.constant 0 : index
      %c0_12 = arith.constant 0 : index
      %28 = vector.load %arg11[%c0_11, %c0_12] : memref<2x128xf32, #tpu.memory_space<vmem>>, vector<1x128xf32>
      %29 = vector.broadcast %28 : vector<1x128xf32> to vector<8x128xf32>
      %30 = arith.mulf %27, %29 : vector<8x128xf32>
      %c1 = arith.constant 1 : index
      %c0_13 = arith.constant 0 : index
      %31 = vector.load %arg11[%c1, %c0_13] : memref<2x128xf32, #tpu.memory_space<vmem>>, vector<1x128xf32>
      %32 = vector.broadcast %31 : vector<1x128xf32> to vector<8x128xf32>
      %33 = arith.addf %30, %32 : vector<8x128xf32>
      %cst = arith.constant 0.000000e+00 : f32
      %34 = vector.broadcast %cst : f32 to vector<8x128xf32>
      %35 = arith.maximumf %33, %34 : vector<8x128xf32>
      %c0_14 = arith.constant 0 : index
      %c0_15 = arith.constant 0 : index
      %36 = vector.load %arg6[%c0_14, %c0_15] : memref<128x8xf32, #tpu.memory_space<vmem>>, vector<128x8xf32>
      %cst_16 = arith.constant dense<0.000000e+00> : vector<8x8xf32>
      %37 = tpu.matmul %35, %36, %cst_16 {dimension_numbers = #tpu.dot_dimension_numbers<[1], [0], [0], [1], [0, 0, 1, 1], [], []>} : vector<8x128xf32>, vector<128x8xf32>, vector<8x8xf32> -> vector<8x8xf32>
      %c0_17 = arith.constant 0 : index
      %c0_18 = arith.constant 0 : index
      %38 = vector.load %arg7[%c0_17, %c0_18] : memref<1x8xf32, #tpu.memory_space<vmem>>, vector<1x8xf32>
      %39 = vector.broadcast %38 : vector<1x8xf32> to vector<8x8xf32>
      %40 = arith.addf %37, %39 : vector<8x8xf32>
      %c0_19 = arith.constant 0 : index
      %c0_20 = arith.constant 0 : index
      %41 = vector.load %arg8[%c0_19, %c0_20] : memref<8x8xf32, #tpu.memory_space<vmem>>, vector<8x8xf32>
      tpu.vector_store %arg8[%c0_19, %c0_20], %40 {strides = array<i32>} : memref<8x8xf32, #tpu.memory_space<vmem>>, vector<8x8xf32>,
    } else {
    }
    return
  }
  func.func @transform_0(%arg0: i32, %arg1: i32) -> (i32, i32) {
    %c0_i32 = arith.constant 0 : i32
    %0 = arith.cmpi eq, %arg0, %c0_i32 : i32
    %c0_i32_0 = arith.constant 0 : i32
    %1 = arith.select %0, %arg1, %c0_i32_0 : i32
    %c0_i32_1 = arith.constant 0 : i32
    %c0_i32_2 = arith.constant 0 : i32
    return %1, %c0_i32_1 : i32, i32
  }
  func.func @transform_1(%arg0: i32, %arg1: i32) -> (i32, i32) {
    %c0_i32 = arith.constant 0 : i32
    %c0_i32_0 = arith.constant 0 : i32
    %c0_i32_1 = arith.constant 0 : i32
    return %c0_i32, %c0_i32_0 : i32, i32
  }
  func.func @transform_2(%arg0: i32, %arg1: i32) -> (i32, i32, i32) {
    %c0_i32 = arith.constant 0 : i32
    %c0_i32_0 = arith.constant 0 : i32
    %c0_i32_1 = arith.constant 0 : i32
    %c0_i32_2 = arith.constant 0 : i32
    return %c0_i32, %c0_i32_0, %c0_i32_1 : i32, i32, i32
  }
  func.func @transform_3(%arg0: i32, %arg1: i32) -> (i32, i32, i32) {
    %c0_i32 = arith.constant 0 : i32
    %c0_i32_0 = arith.constant 0 : i32
    %c0_i32_1 = arith.constant 0 : i32
    %c0_i32_2 = arith.constant 0 : i32
    return %c0_i32, %c0_i32_0, %c0_i32_1 : i32, i32, i32
  }
  func.func @transform_4(%arg0: i32, %arg1: i32) -> (i32, i32) {
    %c0_i32 = arith.constant 0 : i32
    %c0_i32_0 = arith.constant 0 : i32
    %c0_i32_1 = arith.constant 0 : i32
    return %c0_i32, %c0_i32_0 : i32, i32
  }
  func.func @transform_5(%arg0: i32, %arg1: i32) -> (i32, i32) {
    %c0_i32 = arith.constant 0 : i32
    %c0_i32_0 = arith.constant 0 : i32
    %c0_i32_1 = arith.constant 0 : i32
    return %c0_i32, %c0_i32_0 : i32, i32
  }
  func.func @transform_6(%arg0: i32, %arg1: i32) -> (i32, i32) {
    %c2_i32 = arith.constant 2 : i32
    %0 = arith.cmpi eq, %arg0, %c2_i32 : i32
    %c0_i32 = arith.constant 0 : i32
    %1 = arith.select %0, %arg1, %c0_i32 : i32
    %c0_i32_0 = arith.constant 0 : i32
    %c0_i32_1 = arith.constant 0 : i32
    return %1, %c0_i32_0 : i32, i32
  }
}

</mosaic_0001>

<bundles_post_ra>
// kernel: mlp_forward.1
= control target key start
LH: loop header
LB: loop body
LE: loop exit
PB: predicated region body
PF: predicated region fallthrough
CT: control target
= control target key end

     0   :  { %s1023_s21 = smov 0   ;;  %s1025_s22 = smov 0   ;;  %s1195_s0 = inlined_call_operand.vmem [shape: f32[20,16], index: 0, kind: input, shape index: {}]   ;;  %s1196_s1 = inlined_call_operand.vmem [shape: f32[16,128], index: 1, kind: input, shape index: {}]   ;;  %s1197_s2 = inlined_call_operand.vmem [shape: f32[1,128,128], index: 2, kind: input, shape index: {}]   ;;  %s1198_s3 = inlined_call_operand.vmem [shape: f32[2,2,128], index: 3, kind: input, shape index: {}]   ;;  %s1199_s4 = inlined_call_operand.vmem [shape: f32[128,8], index: 4, kind: input, shape index: {}]   ;;  %s1200_s5 = inlined_call_operand.vmem [shape: f32[1,8], index: 5, kind: input, shape index: {}]   ;;  %s1201_s6 = inlined_call_operand.vmem [shape: f32[20,8], index: 6, kind: output, shape index: {}]  }
   0x1   :  { %s1027_s23 = smov 0   ;;  %s1029_s24 = smov 0  }
   0x2   :  { %s1031_s25 = smov 0  }
   0x3 LB: > { %s25_s26 = sadd.s32 1, %s971_s23  ;;  %s28_s27 = sadd.s32 1, %s975_s24  ;;  %s979_s25 = sphi %s1031_s25, %s16_s25   ;;  %s975_s24 = sphi %s1029_s24, %s1205_s24   ;;  %s971_s23 = sphi %s1027_s23, %s1204_s23   ;;  %s967_s22 = sphi %s1025_s22, %s1203_s22   ;;  %s963_s21 = sphi %s1023_s21, %s1202_s21  }
   0x4   : > { %p26_p0 = scmp.ge.s32.totalorder %s25_s26, 3  ;;  %p759_p1 = scmp.ge.s32.totalorder %s979_s25, 1 }
   0x5   : > { %p235_p2 = scmp.lt.s32.totalorder %s979_s25, 10 }
   0x6   : > { %s1207_s26 = smov (%p26_p0, %s25_s26), 0  ;;  %s1209_s27 = smov (!%p26_p0, %s28_s27), %s975_s24 }
   0x7   : > { %p236_p3 = pnand %p759_p1, %p235_p2  ;;  %p30_p4 = scmp.ge.s32.totalorder %s1209_s27, 3 }
   0x8   : > { %p267_p5 = scmp.eq.s32.totalorder (!%p236_p3), %s967_s22, 0  ;;  %p275_p6 = scmp.eq.s32.totalorder (!%p236_p3), %s967_s22, 2 }
   0x9   : > { %s1211_s27 = smov (%p30_p4, %s1209_s27), 0  ;;  %239 = sbr.rel (%p236_p3) target bundleno = 777 (0x309), region = 44 }
   0xa   : > { %p283_p7 = scmp.eq.s32.totalorder (!%p236_p3), %s963_s21, 0  ;;  %p284_p8 = scmp.gt.s32.totalorder (!%p236_p3), %s967_s22, 0 }
   0xc   : > { %p285_p10 = pnand (!%p236_p3), %p284_p8, %p283_p7 }
   0xe   : > { %s268_s28 = scalar_select %p267_p5, %s963_s21, 0 }
   0xf   : > { %s276_s29 = scalar_select %p275_p6, %s963_s21, 0 }
  0x10   : > { %p269_p9 = scmp.lt.s32.totalorder %s268_s28, 2  ;;  %s762_s14 = sadd.s32 (!%p285_p10), 4294967295, %s967_s22 }
  0x11   : > { %p277_p11 = scmp.lt.s32.totalorder %s276_s29, 2  ;;  %288 = sbr.rel (%p285_p10) target bundleno = 54 (0x36), region = 48 }
  0x12   : > { %s1213_s28 = smov (!%p269_p9, %s268_s28), 2  ;;  %p290_p12 = scmp.gt.s32.totalorder (!%p285_p10), %s762_s14, 0 }
  0x13   : > { %s1215_s29 = smov (!%p277_p11, %s276_s29), 2  ;;  %s760_s30 = sshll.u32 %s1213_s28, 3 }
  0x14   : > { %s1068_s9 = scalar_lea.vmem %s1195_s0, %s760_s30  ;;  %s761_s10 = sshll.u32 %s1215_s29, 3 }
  0x15   : > { %s1073_s13 = scalar_lea.vmem %s1201_s6, %s761_s10 }
  0x16   : > { %v292_v0 = vld [vmem:[#allocation3] sm:$0x1]  ;;  %v294_v1 = vld [vmem:[#allocation3 + $0x1] sm:$0x1]  ;;  %s1217_s14 = smov (!%p290_p12, %s762_s14), 0 }
  0x17   : > { %v293_v2 = vmul.f32 0.05, %v292_v0  ;;  %v295_v3 = vmul.f32 0.05, %v294_v1  ;;  %s763_s15 = sshll.u32 %s1217_s14, 1 }
  0x18   : > { %s299_s18 = scalar_lea.vmem %s1198_s3, %s763_s15 }
  0x19   : > { %v296_v4 = vmul.f32 %v293_v2, %v293_v2  ;;  %v300_v7 = vld [vmem:[%s299_s18] sm:$0x3] }
  0x1b   : > { %v297_v5 = vsub.f32 %v295_v3, %v296_v4 }
  0x1d   : > { %v301_v6 = vadd.f32 1e-05, %v297_v5 }
  0x1f   : > { %939 = vrsqrt.f32 %v301_v6 }
  0x2c   : > { %v940_v8 = vpop.eup %939 }
  0x2d   : > { %v303_v9 = vmul.f32 %v940_v8, %v300_v7 }
  0x2f   : > { %304 = vst [vmem:[#allocation4] sm:$0x1] %v303_v9  ;;  %v305_v10 = vmul.f32 %v303_v9, %v293_v2 }
  0x31   : > { %v307_v11 = vrot.slane %v305_v10, 7 }
  0x33   : > { %v309_v12 = vsub.f32 %v300_v7, %v307_v11 }
  0x35   : > { %310 = vst [vmem:[#allocation4] sm:$0x2] %v309_v12 }
  0x36 PF: > { %p764_p13 = scmp.ne.s32.totalorder %s963_s21, 0 }
  0x38   : > { %313 = sbr.rel (%p764_p13) target bundleno = 63 (0x3f), region = 52 }
  0x3d   : > { %v981_v13 = vmov 0.0  }
  0x3e   : > { %314 = vst [vmem:[#allocation3] sm:$0x3] %v981_v13 }
  0x3f PF: > { %v315_v14 = vlaneseq  ;;  %s1081_s19 = sshll.u32 %s963_s21, 3  ;;  %p766_p0 = scmp.ne.s32.totalorder %s967_s22, 0 }
  0x40   : > { %v318_v15 = vstv %s1081_s19  ;;  %s405_s30 = scalar_lea.vmem (!%p766_p0), [#allocation2], %s1081_s19 }
  0x41   : > { %v316_v16 = vshrl.u32 %v315_v14, 7  ;;  %324 = sbr.rel (%p766_p0) target bundleno = 286 (0x11e), region = 56 }
  0x43   : > { %v1084_v17 = vadd.s32 %v318_v15, %v316_v16 }
  0x45   : > { %vm320_vm0 = vcmp.lt.s32.totalorder %v1084_v17, 20 }
  0x46   : > { %v327_v18 = vld [vmem:[%s1196_s1 + $0x8] sm:$0xff]  ;;  %v982_v19 = vmov 0.0   ;;  %v326_v20 = vld [vmem:[%s1196_s1] sm:$0xff]  ;;  %vm983_vm1 = vmmov 0   ;;  %vm328_vm2 = vcmask 130048  }
  0x47   : > { %815 = vmatprep.subr.mxu0 %v982_v19  ;;  %819 = vmatprep.mubr.msk.f32.mxu0 %vm983_vm1, %v982_v19  ;;  %v325_v21 = vld [vmem:[%s1068_s9] sm:$0xff]  ;;  %v407_v35 = vld [vmem:[#allocation3] sm:$0x1]  ;;  %v416_v38 = vld [vmem:[#allocation3 + $0x1] sm:$0x1] }
  0x48   : > { %816 = vmatpush3.msra.mxu0 %v327_v18 }
  0x49   : > { %817 = vmatprep.subr.mxu0 %v982_v19 }
  0x4a   : > { %818 = vmatpush3.msra.mxu0 %v326_v20 }
  0x4b   : > { %820 = vmatmul.mubr.msk.f32.vlgmr.msra.gmra.mxu0 %vm328_vm2, %v325_v21 }
 0x10b   : > { %v398_v22 = vpop.f32.mrf.mxu0 }
 0x10c   : > { %v404_v23 = vsel %vm320_vm0, %v398_v22, 0.0 }
 0x10d   : > { %406 = vst [vmem:[%s405_s30] sm:$0xff] %v404_v23  ;;  %v408_v24 = vrot.slane %v404_v23, 4  ;;  %v417_v25 = vmul.f32 %v404_v23, %v404_v23  ;;  %v821_v26 = vpop.f32.mrf.mxu0 }
 0x10f   : > { %v409_v27 = vadd.f32 %v408_v24, %v404_v23  ;;  %v418_v28 = vrot.slane %v417_v25, 4 }
 0x111   : > { %v410_v29 = vrot.slane %v409_v27, 2  ;;  %v419_v30 = vadd.f32 %v418_v28, %v417_v25 }
 0x113   : > { %v411_v31 = vadd.f32 %v410_v29, %v409_v27  ;;  %v420_v32 = vrot.slane %v419_v30, 2 }
 0x115   : > { %v412_v33 = vrot.slane %v411_v31, 1  ;;  %v421_v34 = vadd.f32 %v420_v32, %v419_v30 }
 0x117   : > { %v413_v36 = vadd.f32 %v412_v33, %v411_v31  ;;  %v422_v37 = vrot.slane %v421_v34, 1 }
 0x119   : > { %v414_v39 = vadd.f32 %v413_v36, %v407_v35  ;;  %v423_v40 = vadd.f32 %v422_v37, %v421_v34 }
 0x11b   : > { %415 = vst [vmem:[#allocation3] sm:$0x1] %v414_v39  ;;  %v424_v41 = vadd.f32 %v423_v40, %v416_v38 }
 0x11d   : > { %425 = vst [vmem:[#allocation3 + $0x1] sm:$0x1] %v424_v41 }
 0x11e PF: > { %p426_p1 = scmp.lt.s32.totalorder %s967_s22, 2 }
 0x120   : > { %p427_p2 = pnand %p426_p1, %p284_p8 }
 0x121   : > { %s768_s7 = sadd.s32 (!%p427_p2), 4294967295, %s967_s22  ;;  %s452_s12 = scalar_lea.vmem (!%p427_p2), [#allocation2], %s1081_s19 }
 0x122   : > { %430 = sbr.rel (%p427_p2) target bundleno = 541 (0x21d), region = 60  ;;  %p432_p3 = scmp.gt.s32.totalorder (!%p427_p2), %s768_s7, 0 }
 0x127   : > { %v984_v42 = vmov 0.0   ;;  %vm985_vm3 = vmmov 0   ;;  %s1219_s7 = smov (!%p432_p3, %s768_s7), 0  ;;  %v453_v53 = vld [vmem:[%s452_s12] sm:$0xff]  ;;  %v770_v54 = vld [vmem:[#allocation4] ss:$0 sm:$0xff] }
 0x128   : > { %822 = vmatprep.subr.mxu0 %v984_v42  ;;  %854 = vmatprep.mubr.msk.f32.mxu0 %vm985_vm3, %v984_v42  ;;  %s769_s8 = sshll.u32 %s1219_s7, 7  ;;  %v459_v57 = vmul.f32 %v770_v54, %v453_v53  ;;  %v771_v58 = vld [vmem:[#allocation4 + $0x1] ss:$0 sm:$0xff]  ;;  %v541_v14 = vld [vmem:[#allocation3] sm:$0x1] }
 0x129   : > { %s1105_s11 = scalar_lea.vmem %s1197_s2, %s769_s8  ;;  %v550_v18 = vld [vmem:[#allocation3 + $0x1] sm:$0x1] }
 0x12a   : > { %v451_v43 = vld [vmem:[%s1105_s11 + $0x78] sm:$0xff]  ;;  %v450_v44 = vld [vmem:[%s1105_s11 + $0x70] sm:$0xff]  ;;  %v449_v45 = vld [vmem:[%s1105_s11 + $0x68] sm:$0xff]  ;;  %v465_v61 = vadd.f32 %v771_v58, %v459_v57 }
 0x12b   : > { %823 = vmatpush3.msra.mxu0 %v451_v43  ;;  %v448_v46 = vld [vmem:[%s1105_s11 + $0x60] sm:$0xff]  ;;  %v447_v47 = vld [vmem:[%s1105_s11 + $0x58] sm:$0xff]  ;;  %v446_v48 = vld [vmem:[%s1105_s11 + $0x50] sm:$0xff] }
 0x12c   : > { %824 = vmatprep.subr.mxu0 %v984_v42  ;;  %v445_v49 = vld [vmem:[%s1105_s11 + $0x48] sm:$0xff]  ;;  %v444_v50 = vld [vmem:[%s1105_s11 + $0x40] sm:$0xff]  ;;  %v443_v51 = vld [vmem:[%s1105_s11 + $0x38] sm:$0xff]  ;;  %v466_v0 = vmax.f32 %v465_v61, 0.0 }
 0x12d   : > { %825 = vmatpush3.msra.mxu0 %v450_v44  ;;  %v442_v52 = vld [vmem:[%s1105_s11 + $0x30] sm:$0xff]  ;;  %v441_v55 = vld [vmem:[%s1105_s11 + $0x28] sm:$0xff]  ;;  %v440_v56 = vld [vmem:[%s1105_s11 + $0x20] sm:$0xff] }
 0x12e   : > { %826 = vmatprep.subr.mxu0 %v984_v42  ;;  %v439_v59 = vld [vmem:[%s1105_s11 + $0x18] sm:$0xff]  ;;  %v438_v60 = vld [vmem:[%s1105_s11 + $0x10] sm:$0xff]  ;;  %v437_v62 = vld [vmem:[%s1105_s11 + $0x8] sm:$0xff] }
 0x12f   : > { %827 = vmatpush3.msra.mxu0 %v449_v45  ;;  %v436_v63 = vld [vmem:[%s1105_s11] sm:$0xff] }
 0x130   : > { %828 = vmatprep.subr.mxu0 %v984_v42 }
 0x131   : > { %829 = vmatpush3.msra.mxu0 %v448_v46 }
 0x132   : > { %830 = vmatprep.subr.mxu0 %v984_v42 }
 0x133   : > { %831 = vmatpush3.msra.mxu0 %v447_v47 }
 0x134   : > { %832 = vmatprep.subr.mxu0 %v984_v42 }
 0x135   : > { %833 = vmatpush3.msra.mxu0 %v446_v48 }
 0x136   : > { %834 = vmatprep.subr.mxu0 %v984_v42 }
 0x137   : > { %835 = vmatpush3.msra.mxu0 %v445_v49 }
 0x138   : > { %836 = vmatprep.subr.mxu0 %v984_v42 }
 0x139   : > { %837 = vmatpush3.msra.mxu0 %v444_v50 }
 0x13a   : > { %838 = vmatprep.subr.mxu0 %v984_v42 }
 0x13b   : > { %839 = vmatpush3.msra.mxu0 %v443_v51 }
 0x13c   : > { %840 = vmatprep.subr.mxu0 %v984_v42 }
 0x13d   : > { %841 = vmatpush3.msra.mxu0 %v442_v52 }
 0x13e   : > { %842 = vmatprep.subr.mxu0 %v984_v42 }
 0x13f   : > { %843 = vmatpush3.msra.mxu0 %v441_v55 }
 0x140   : > { %844 = vmatprep.subr.mxu0 %v984_v42 }
 0x141   : > { %845 = vmatpush3.msra.mxu0 %v440_v56 }
 0x142   : > { %846 = vmatprep.subr.mxu0 %v984_v42 }
 0x143   : > { %847 = vmatpush3.msra.mxu0 %v439_v59 }
 0x144   : > { %848 = vmatprep.subr.mxu0 %v984_v42 }
 0x145   : > { %849 = vmatpush3.msra.mxu0 %v438_v60 }
 0x146   : > { %850 = vmatprep.subr.mxu0 %v984_v42 }
 0x147   : > { %851 = vmatpush3.msra.mxu0 %v437_v62 }
 0x148   : > { %852 = vmatprep.subr.mxu0 %v984_v42 }
 0x149   : > { %853 = vmatpush3.msra.mxu0 %v436_v63 }
 0x14a   : > { %855 = vmatmul.mubr.f32.vlgmr.msra.gmra.mxu0 %v466_v0 }
 0x20a   : > { %v533_v1 = vpop.f32.mrf.mxu0 }
 0x20b   : > { %v539_v2 = vsel %vm320_vm0, %v533_v1, 0.0 }
 0x20c   : > { %540 = vst [vmem:[%s452_s12] sm:$0xff] %v539_v2  ;;  %v542_v3 = vrot.slane %v539_v2, 4  ;;  %v551_v4 = vmul.f32 %v539_v2, %v539_v2  ;;  %v856_v5 = vpop.f32.mrf.mxu0 }
 0x20e   : > { %v543_v6 = vadd.f32 %v542_v3, %v539_v2  ;;  %v552_v7 = vrot.slane %v551_v4, 4 }
 0x210   : > { %v544_v8 = vrot.slane %v543_v6, 2  ;;  %v553_v9 = vadd.f32 %v552_v7, %v551_v4 }
 0x212   : > { %v545_v10 = vadd.f32 %v544_v8, %v543_v6  ;;  %v554_v11 = vrot.slane %v553_v9, 2 }
 0x214   : > { %v546_v12 = vrot.slane %v545_v10, 1  ;;  %v555_v13 = vadd.f32 %v554_v11, %v553_v9 }
 0x216   : > { %v547_v15 = vadd.f32 %v546_v12, %v545_v10  ;;  %v556_v16 = vrot.slane %v555_v13, 1 }
 0x218   : > { %v548_v19 = vadd.f32 %v547_v15, %v541_v14  ;;  %v557_v20 = vadd.f32 %v556_v16, %v555_v13 }
 0x21a   : > { %549 = vst [vmem:[#allocation3] sm:$0x1] %v548_v19  ;;  %v558_v17 = vadd.f32 %v557_v20, %v550_v18 }
 0x21c   : > { %559 = vst [vmem:[#allocation3 + $0x1] sm:$0x1] %v558_v17 }
 0x21d PF: > { %p772_p4 = scmp.ne.s32.totalorder %s967_s22, 2 }
 0x21e   : > { %s564_s17 = scalar_lea.vmem (!%p772_p4), [#allocation2], %s1081_s19 }
 0x21f   : > { %563 = sbr.rel (%p772_p4) target bundleno = 777 (0x309), region = 64 }
 0x224   : > { %v594_v21 = vld [vmem:[%s1199_s4 + $0x78] sm:$0xff]  ;;  %v986_v22 = vmov 0.0   ;;  %v593_v23 = vld [vmem:[%s1199_s4 + $0x70] sm:$0xff]  ;;  %vm987_vm4 = vmmov 0   ;;  %v592_v24 = vld [vmem:[%s1199_s4 + $0x68] sm:$0xff]  ;;  %vm672_vm5 = vcmask 64512  }
 0x225   : > { %857 = vmatprep.subr.mxu0 %v986_v22  ;;  %889 = vmatprep.mubr.msk.f32.mxu0 %vm987_vm4, %v986_v22  ;;  %v591_v25 = vld [vmem:[%s1199_s4 + $0x60] sm:$0xff]  ;;  %v590_v26 = vld [vmem:[%s1199_s4 + $0x58] sm:$0xff]  ;;  %v589_v27 = vld [vmem:[%s1199_s4 + $0x50] sm:$0xff] }
 0x226   : > { %858 = vmatpush3.msra.mxu0 %v594_v21  ;;  %v588_v28 = vld [vmem:[%s1199_s4 + $0x48] sm:$0xff]  ;;  %v587_v29 = vld [vmem:[%s1199_s4 + $0x40] sm:$0xff]  ;;  %v586_v30 = vld [vmem:[%s1199_s4 + $0x38] sm:$0xff] }
 0x227   : > { %859 = vmatprep.subr.mxu0 %v986_v22  ;;  %v585_v31 = vld [vmem:[%s1199_s4 + $0x30] sm:$0xff]  ;;  %v565_v32 = vld [vmem:[%s564_s17] sm:$0xff]  ;;  %v773_v33 = vld [vmem:[#allocation4] ss:$0 sm:$0xff] }
 0x228   : > { %860 = vmatpush3.msra.mxu0 %v593_v23  ;;  %v584_v34 = vld [vmem:[%s1199_s4 + $0x28] sm:$0xff]  ;;  %v583_v35 = vld [vmem:[%s1199_s4 + $0x20] sm:$0xff]  ;;  %v571_v36 = vmul.f32 %v773_v33, %v565_v32  ;;  %v774_v37 = vld [vmem:[#allocation4 + $0x1] ss:$0 sm:$0xff] }
 0x229   : > { %861 = vmatprep.subr.mxu0 %v986_v22  ;;  %v582_v38 = vld [vmem:[%s1199_s4 + $0x18] sm:$0xff]  ;;  %v581_v39 = vld [vmem:[%s1199_s4 + $0x10] sm:$0xff]  ;;  %v580_v41 = vld [vmem:[%s1199_s4 + $0x8] sm:$0xff] }
 0x22a   : > { %862 = vmatpush3.msra.mxu0 %v592_v24  ;;  %v577_v40 = vadd.f32 %v774_v37, %v571_v36  ;;  %v579_v42 = vld [vmem:[%s1199_s4] sm:$0xff] }
 0x22b   : > { %863 = vmatprep.subr.mxu0 %v986_v22  ;;  %v775_v44 = vld [vmem:[%s1200_s5] ss:$0 sm:$0xff] }
 0x22c   : > { %864 = vmatpush3.msra.mxu0 %v591_v25  ;;  %v578_v43 = vmax.f32 %v577_v40, 0.0 }
 0x22d   : > { %865 = vmatprep.subr.mxu0 %v986_v22 }
 0x22e   : > { %866 = vmatpush3.msra.mxu0 %v590_v26 }
 0x22f   : > { %867 = vmatprep.subr.mxu0 %v986_v22 }
 0x230   : > { %868 = vmatpush3.msra.mxu0 %v589_v27 }
 0x231   : > { %869 = vmatprep.subr.mxu0 %v986_v22 }
 0x232   : > { %870 = vmatpush3.msra.mxu0 %v588_v28 }
 0x233   : > { %871 = vmatprep.subr.mxu0 %v986_v22 }
 0x234   : > { %872 = vmatpush3.msra.mxu0 %v587_v29 }
 0x235   : > { %873 = vmatprep.subr.mxu0 %v986_v22 }
 0x236   : > { %874 = vmatpush3.msra.mxu0 %v586_v30 }
 0x237   : > { %875 = vmatprep.subr.mxu0 %v986_v22 }
 0x238   : > { %876 = vmatpush3.msra.mxu0 %v585_v31 }
 0x239   : > { %877 = vmatprep.subr.mxu0 %v986_v22 }
 0x23a   : > { %878 = vmatpush3.msra.mxu0 %v584_v34 }
 0x23b   : > { %879 = vmatprep.subr.mxu0 %v986_v22 }
 0x23c   : > { %880 = vmatpush3.msra.mxu0 %v583_v35 }
 0x23d   : > { %881 = vmatprep.subr.mxu0 %v986_v22 }
 0x23e   : > { %882 = vmatpush3.msra.mxu0 %v582_v38 }
 0x23f   : > { %883 = vmatprep.subr.mxu0 %v986_v22 }
 0x240   : > { %884 = vmatpush3.msra.mxu0 %v581_v39 }
 0x241   : > { %885 = vmatprep.subr.mxu0 %v986_v22 }
 0x242   : > { %886 = vmatpush3.msra.mxu0 %v580_v41 }
 0x243   : > { %887 = vmatprep.subr.mxu0 %v986_v22 }
 0x244   : > { %888 = vmatpush3.msra.mxu0 %v579_v42 }
 0x245   : > { %890 = vmatmul.mubr.f32.vlgmr.msra.gmra.mxu0 %v578_v43 }
 0x305   : > { %v668_v45 = vpop.f32.mrf.mxu0 }
 0x306   : > { %v669_v46 = vadd.f32 %v775_v44, %v668_v45 }
 0x307   : > { %v891_v47 = vpop.f32.mrf.mxu0 }
 0x308   : > { %673 = vst.msk [vmem:[%s1073_s13] sm:$0xff] %vm672_vm5, %v669_v46 }
 0x309 PF: > { %s16_s25 = sadd.s32 1, %s979_s25   ;;  %s1202_s21 = smov %s971_s23 }
 0x30a   : > { %p13_p5 = scmp.ge.s32.totalorder %s16_s25, 11   ;;  %s1203_s22 = smov %s975_s24 }
 0x30b   : > { %s1204_s23 = smov %s1207_s26  ;;  %s1205_s24 = smov %s1211_s27 }
 0x30c   :  { %15 = sbr.rel (!%p13_p5) target bundleno = 3 (0x3), region = 99 }

</bundles_post_ra>
